<compile_context>
chip_gen: v7x
topology: tpu7x:2x2x1
jax: 0.10.0
libtpu: 0.0.40
codegen_flags: <defaults>
</compile_context>

<pallas_src>
import functools

import jax
import jax.numpy as jnp
from jax.experimental import pallas as pl
from jax.experimental.pallas import tpu as pltpu


# ----------------------------------------------------------------------------
# Fused kernel: whole LprDetection forward for one lane-tile of B_blk images.
#   x_ref    : (C2, L)         input activations, L = B_blk*H*W on lanes
#   wpt_ref  : (2*C1+1, C2)    packed 1x1 weights: rows [0:C1]=w1, [C1:2C1]=w3,
#                              [2C1]=attention weight
#   wcv_ref  : (2*C2, 9*C1)    packed 3x3 weights (tap-major K), rows
#                              [0:C2]=conv2, [C2:2C2]=conv4
#   mask_ref : (9, L)          per-tap validity mask (image edges, batch
#                              boundaries, roll wrap)
#   feat_ref : (C2, L)         lp_feature output
#   att_ref  : (1, L)          attention_map output
#   scr_ref  : (9*C1, L)       VMEM im2col scratch
# ----------------------------------------------------------------------------
def _fused_lpr_kernel(x_ref, wpt_ref, wcv_ref, mask_ref,
                      feat_ref, att_ref, scr_ref, *, C1, C2, W):
    L = x_ref.shape[-1]

    def lrelu(y):
        # exact LeakyReLU(0.1) since slope < 1: single vmax, no cmp+select
        return jnp.maximum(y, 0.1 * y)

    def mm(w, a):
        return jnp.dot(w, a, preferred_element_type=jnp.float32)

    def conv3x3(a, w):
        # a: (C1, L).  Build the (9*C1, L) im2col slab in VMEM, then ONE matmul.
        for t in range(9):
            dy, dx = t // 3 - 1, t % 3 - 1
            s = dy * W + dx                              # source lane offset
            if s == 0:
                sh = a
            else:
                sh = pltpu.roll(a, shift=(-s) % L, axis=1)   # XLU lane rotate
                sh = sh * mask_ref[t:t + 1, :]               # zero invalid lanes
            scr_ref[t * C1:(t + 1) * C1, :] = sh
        return mm(w, scr_ref[...])                       # (C2, 9*C1) x (9*C1, L)

    # resident packed weights (tiny; stay in VMEM across the whole grid)
    w1 = wpt_ref[0:C1, :]                    # (C1, C2)
    w3 = wpt_ref[C1:2 * C1, :]               # (C1, C2)
    watt = wpt_ref[2 * C1:2 * C1 + 1, :]     # (1,  C2)
    w2 = wcv_ref[0:C2, :]                    # (C2, 9*C1)
    w4 = wcv_ref[C2:2 * C2, :]               # (C2, 9*C1)

    x = x_ref[...]                           # (C2, L) f32
    h = lrelu(mm(w1, x))                     # (C1, L)
    h = lrelu(conv3x3(h, w2))                # (C2, L)
    h = lrelu(mm(w3, h))                     # (C1, L)
    h = lrelu(conv3x3(h, w4))                # (C2, L)
    feat_ref[...] = h
    att_ref[...] = lrelu(mm(watt, h))        # (1, L)


# ----------------------------------------------------------------------------
# Batch-block picker: whole images per grid step, lane width multiple of 128,
# and (when possible) grid >= 2 so both v7x TensorCores get work.
# ----------------------------------------------------------------------------
def _pick_batch_block(N, F):
    if F % 128 != 0:
        return N                      # single full-extent block (full-dim rule)
    bb = min(N, max(1, 2048 // F))    # aim for ~2048 lanes per grid step
    while N % bb:
        bb -= 1
    if bb == N and N >= 2:            # keep >=2 grid steps for v7x megacore
        bb = N // 2
        while N % bb:
            bb -= 1
    return max(bb, 1)


# ----------------------------------------------------------------------------
# Public wrapper: exact LprDetection.forward, NCHW in / NCHW out.
# ----------------------------------------------------------------------------
def lpr_detection_forward(x_nchw, weights):
    w1, w2, w3, w4, w_att = weights                  # torch OIHW layouts
    N, C2, H, W = x_nchw.shape
    C1 = w1.shape[0]
    F = H * W
    B_blk = _pick_batch_block(N, F)
    L_blk = B_blk * F
    n_steps = N // B_blk

    # ---- layout: (C2, N*F) — batch+spatial flattened onto the lane axis ----
    x2 = jnp.transpose(x_nchw.reshape(N, C2, F), (1, 0, 2)).reshape(C2, N * F)

    # ---- pack 5 tiny weight arrays into 2 resident inputs ----
    wpt = jnp.concatenate(
        [w1[:, :, 0, 0], w3[:, :, 0, 0], w_att[:, :, 0, 0]], axis=0)   # (2*C1+1, C2)
    # 3x3 weights, tap-major K: column index = (ky*3+kx)*C1 + cin
    w2r = jnp.transpose(w2, (0, 2, 3, 1)).reshape(C2, 9 * C1)
    w4r = jnp.transpose(w4, (0, 2, 3, 1)).reshape(C2, 9 * C1)
    wcv = jnp.concatenate([w2r, w4r], axis=0)                          # (2*C2, 9*C1)

    # ---- per-tap validity masks (same for every grid tile, fetched once) ----
    g = jnp.arange(L_blk, dtype=jnp.int32)
    col = g % W
    row = (g // W) % H
    ok = {
        -1: (row >= 1, col >= 1),
        0: (jnp.ones_like(row, dtype=bool), jnp.ones_like(col, dtype=bool)),
        1: (row <= H - 2, col <= W - 2),
    }
    masks = jnp.stack(
        [(ok[dy][0] & ok[dx][1]).astype(jnp.float32)
         for dy in (-1, 0, 1) for dx in (-1, 0, 1)], axis=0)           # (9, L_blk)

    # ---- scheduling hints ----
    flops = int(N * F * (2 * 2 * C1 * C2 + 2 * 2 * 9 * C1 * C2 + 2 * C2))
    bytes_accessed = int(4 * N * F * (2 * C2 + 1)
                         + 4 * (wpt.size + wcv.size + masks.size))
    cost = pl.CostEstimate(flops=flops, transcendentals=0,
                           bytes_accessed=bytes_accessed)

    # VMEM budget: in/out double-buffered + masks + im2col scratch + live temps.
    vmem_est = 4 * L_blk * (2 * (2 * C2 + 1) + 9 + 9 * C1 + 4 * C1 + 3 * C2)
    vmem_est += 4 * 2 * (wpt.size + wcv.size)
    vmem_limit = int(min(max(4 * vmem_est, 16 * 2**20), 32 * 2**20))

    kern = functools.partial(_fused_lpr_kernel, C1=C1, C2=C2, W=W)
    feat, att = pl.pallas_call(
        kern,
        out_shape=(jax.ShapeDtypeStruct((C2, N * F), jnp.float32),
                   jax.ShapeDtypeStruct((1, N * F), jnp.float32)),
        grid_spec=pltpu.PrefetchScalarGridSpec(
            num_scalar_prefetch=0,
            grid=(n_steps,),
            in_specs=[
                pl.BlockSpec((C2, L_blk), lambda i: (0, i)),           # x tile
                pl.BlockSpec((2 * C1 + 1, C2), lambda i: (0, 0)),      # 1x1 weights
                pl.BlockSpec((2 * C2, 9 * C1), lambda i: (0, 0)),      # 3x3 weights
                pl.BlockSpec((9, L_blk), lambda i: (0, 0)),            # tap masks
            ],
            out_specs=[
                pl.BlockSpec((C2, L_blk), lambda i: (0, i)),           # lp_feature
                pl.BlockSpec((1, L_blk), lambda i: (0, i)),            # attention
            ],
            scratch_shapes=[pltpu.VMEM((9 * C1, L_blk), jnp.float32)],  # im2col
        ),
        compiler_params=pltpu.CompilerParams(
            dimension_semantics=("parallel",),
            vmem_limit_bytes=vmem_limit),
        cost_estimate=cost,
    )(x2, wpt, wcv, masks)

    feat_nchw = jnp.transpose(feat.reshape(C2, N, F), (1, 0, 2)).reshape(N, C2, H, W)
    att_nchw = att.reshape(N, 1, H, W)
    return feat_nchw, att_nchw


# ----------------------------------------------------------------------------
# Deterministic parameter init (torch Conv2d weight layout: O, I, kH, kW)
# ----------------------------------------------------------------------------
def init_weights(key, channel1, channel2):
    ks = jax.random.split(key, 5)

    def w(k, cout, cin, kh, kw):
        fan_in = cin * kh * kw
        return jax.random.normal(k, (cout, cin, kh, kw), jnp.float32) / jnp.sqrt(fan_in)

    return (
        w(ks[0], channel1, channel2, 1, 1),   # lp_wh_conv[0]
        w(ks[1], channel2, channel1, 3, 3),   # lp_wh_conv[2]
        w(ks[2], channel1, channel2, 1, 1),   # lp_wh_conv[4]
        w(ks[3], channel2, channel1, 3, 3),   # lp_wh_conv[6]
        w(ks[4], 1, channel2, 1, 1),          # attention_conv[0]
    )


# ----------------------------------------------------------------------------
# Pure-JAX reference (lax.conv, NCHW, full f32) for the correctness check
# ----------------------------------------------------------------------------
def _ref_forward(x_nchw, weights):
    def conv(x, w, pad):
        return jax.lax.conv_general_dilated(
            x, w, (1, 1), [(pad, pad), (pad, pad)],
            dimension_numbers=("NCHW", "OIHW", "NCHW"),
            precision=jax.lax.Precision.HIGHEST)

    def lrelu(v):
        return jnp.where(v > 0, v, 0.1 * v)

    w1, w2, w3, w4, w_att = weights
    h = lrelu(conv(x_nchw, w1, 0))
    h = lrelu(conv(h, w2, 1))
    h = lrelu(conv(h, w3, 0))
    h = lrelu(conv(h, w4, 1))
    att = lrelu(conv(h, w_att, 0))
    return h, att


if __name__ == "__main__":
    key = jax.random.PRNGKey(0)
    kx, kw = jax.random.split(key)

    channel1, channel2 = 4, 8          # LprDetection(channel1=4, channel2=8)
    N, H, W = 2, 16, 16
    x = jax.random.normal(kx, (N, channel2, H, W), jnp.float32)
    weights = init_weights(kw, channel1, channel2)

    lp_feature, attention_map = jax.jit(lpr_detection_forward)(x, weights)
    jax.block_until_ready((lp_feature, attention_map))

    assert lp_feature.shape == (N, channel2, H, W)
    assert attention_map.shape == (N, 1, H, W)

    lp_ref, att_ref = _ref_forward(x, weights)
    assert jnp.allclose(lp_feature, lp_ref, rtol=1e-2, atol=1e-2), \
        float(jnp.max(jnp.abs(lp_feature - lp_ref)))
    assert jnp.allclose(attention_map, att_ref, rtol=1e-2, atol=1e-2), \
        float(jnp.max(jnp.abs(attention_map - att_ref)))

    print("KERNEL_OK")
</pallas_src>

<mosaic_0001>
module attributes {stable_mosaic.version = 11 : i64} {
  func.func @_fused_lpr_kernel(%arg0: i32, %arg1: memref<8x256xf32, #tpu.memory_space<vmem>>, %arg2: memref<9x8xf32, #tpu.memory_space<vmem>>, %arg3: memref<16x36xf32, #tpu.memory_space<vmem>>, %arg4: memref<9x256xf32, #tpu.memory_space<vmem>>, %arg5: memref<8x256xf32, #tpu.memory_space<vmem>>, %arg6: memref<1x256xf32, #tpu.memory_space<vmem>>, %arg7: memref<36x256xf32, #tpu.memory_space<vmem>>) attributes {dimension_semantics = [#tpu.dimension_semantics<parallel>], iteration_bounds = array<i64: 2>, scalar_prefetch = 0 : i64, scratch_operands = 1 : i64, tpu.core_type = #tpu.core_type<tc>, window_params = [{transform_indices = @transform_0, window_bounds = array<i64: 8, 256>}, {pipeline_mode = #tpu.pipeline_mode<synchronous>, transform_indices = @transform_1, window_bounds = array<i64: 9, 8>}, {pipeline_mode = #tpu.pipeline_mode<synchronous>, transform_indices = @transform_2, window_bounds = array<i64: 16, 36>}, {pipeline_mode = #tpu.pipeline_mode<synchronous>, transform_indices = @transform_3, window_bounds = array<i64: 9, 256>}, {transform_indices = @transform_4, window_bounds = array<i64: 8, 256>}, {transform_indices = @transform_5, window_bounds = array<i64: 1, 256>}]} {
    %c0 = arith.constant 0 : index
    %c0_0 = arith.constant 0 : index
    %0 = vector.load %arg2[%c0, %c0_0] : memref<9x8xf32, #tpu.memory_space<vmem>>, vector<4x8xf32>
    %c4 = arith.constant 4 : index
    %c0_1 = arith.constant 0 : index
    %1 = vector.load %arg2[%c4, %c0_1] : memref<9x8xf32, #tpu.memory_space<vmem>>, vector<4x8xf32>
    %c8 = arith.constant 8 : index
    %c0_2 = arith.constant 0 : index
    %2 = vector.load %arg2[%c8, %c0_2] : memref<9x8xf32, #tpu.memory_space<vmem>>, vector<1x8xf32>
    %c0_3 = arith.constant 0 : index
    %c0_4 = arith.constant 0 : index
    %3 = vector.load %arg3[%c0_3, %c0_4] : memref<16x36xf32, #tpu.memory_space<vmem>>, vector<8x36xf32>
    %c8_5 = arith.constant 8 : index
    %c0_6 = arith.constant 0 : index
    %4 = vector.load %arg3[%c8_5, %c0_6] : memref<16x36xf32, #tpu.memory_space<vmem>>, vector<8x36xf32>
    %c0_7 = arith.constant 0 : index
    %c0_8 = arith.constant 0 : index
    %5 = vector.load %arg1[%c0_7, %c0_8] : memref<8x256xf32, #tpu.memory_space<vmem>>, vector<8x256xf32>
    %cst = arith.constant dense<0.000000e+00> : vector<4x256xf32>
    %6 = tpu.matmul %0, %5, %cst {dimension_numbers = #tpu.dot_dimension_numbers<[1], [0], [0], [1], [0, 0, 1, 1], [], []>} : vector<4x8xf32>, vector<8x256xf32>, vector<4x256xf32> -> vector<4x256xf32>
    %cst_9 = arith.constant 1.000000e-01 : f32
    %7 = vector.broadcast %cst_9 : f32 to vector<4x256xf32>
    %8 = arith.mulf %7, %6 : vector<4x256xf32>
    %9 = arith.maximumf %6, %8 : vector<4x256xf32>
    %c17_i32 = arith.constant 17 : i32
    %10 = tpu.dynamic_rotate %9 by %c17_i32 dim 1 : vector<4x256xf32>, i32 -> vector<4x256xf32>
    %c0_10 = arith.constant 0 : index
    %c0_11 = arith.constant 0 : index
    %11 = vector.load %arg4[%c0_10, %c0_11] : memref<9x256xf32, #tpu.memory_space<vmem>>, vector<1x256xf32>
    %12 = vector.broadcast %11 : vector<1x256xf32> to vector<4x256xf32>
    %13 = arith.mulf %10, %12 : vector<4x256xf32>
    %c0_12 = arith.constant 0 : index
    %c0_13 = arith.constant 0 : index
    %14 = vector.load %arg7[%c0_12, %c0_13] : memref<36x256xf32, #tpu.memory_space<vmem>>, vector<4x256xf32>
    tpu.vector_store %arg7[%c0_12, %c0_13], %13 {strides = array<i32>} : memref<36x256xf32, #tpu.memory_space<vmem>>, vector<4x256xf32>,
    %c16_i32 = arith.constant 16 : i32
    %15 = tpu.dynamic_rotate %9 by %c16_i32 dim 1 : vector<4x256xf32>, i32 -> vector<4x256xf32>
    %c1 = arith.constant 1 : index
    %c0_14 = arith.constant 0 : index
    %16 = vector.load %arg4[%c1, %c0_14] : memref<9x256xf32, #tpu.memory_space<vmem>>, vector<1x256xf32>
    %17 = vector.broadcast %16 : vector<1x256xf32> to vector<4x256xf32>
    %18 = arith.mulf %15, %17 : vector<4x256xf32>
    %c4_15 = arith.constant 4 : index
    %c0_16 = arith.constant 0 : index
    %19 = vector.load %arg7[%c4_15, %c0_16] : memref<36x256xf32, #tpu.memory_space<vmem>>, vector<4x256xf32>
    tpu.vector_store %arg7[%c4_15, %c0_16], %18 {strides = array<i32>} : memref<36x256xf32, #tpu.memory_space<vmem>>, vector<4x256xf32>,
    %c15_i32 = arith.constant 15 : i32
    %20 = tpu.dynamic_rotate %9 by %c15_i32 dim 1 : vector<4x256xf32>, i32 -> vector<4x256xf32>
    %c2 = arith.constant 2 : index
    %c0_17 = arith.constant 0 : index
    %21 = vector.load %arg4[%c2, %c0_17] : memref<9x256xf32, #tpu.memory_space<vmem>>, vector<1x256xf32>
    %22 = vector.broadcast %21 : vector<1x256xf32> to vector<4x256xf32>
    %23 = arith.mulf %20, %22 : vector<4x256xf32>
    %c8_18 = arith.constant 8 : index
    %c0_19 = arith.constant 0 : index
    %24 = vector.load %arg7[%c8_18, %c0_19] : memref<36x256xf32, #tpu.memory_space<vmem>>, vector<4x256xf32>
    tpu.vector_store %arg7[%c8_18, %c0_19], %23 {strides = array<i32>} : memref<36x256xf32, #tpu.memory_space<vmem>>, vector<4x256xf32>,
    %c1_i32 = arith.constant 1 : i32
    %25 = tpu.dynamic_rotate %9 by %c1_i32 dim 1 : vector<4x256xf32>, i32 -> vector<4x256xf32>
    %c3 = arith.constant 3 : index
    %c0_20 = arith.constant 0 : index
    %26 = vector.load %arg4[%c3, %c0_20] : memref<9x256xf32, #tpu.memory_space<vmem>>, vector<1x256xf32>
    %27 = vector.broadcast %26 : vector<1x256xf32> to vector<4x256xf32>
    %28 = arith.mulf %25, %27 : vector<4x256xf32>
    %c12 = arith.constant 12 : index
    %c0_21 = arith.constant 0 : index
    %29 = vector.load %arg7[%c12, %c0_21] : memref<36x256xf32, #tpu.memory_space<vmem>>, vector<4x256xf32>
    tpu.vector_store %arg7[%c12, %c0_21], %28 {strides = array<i32>} : memref<36x256xf32, #tpu.memory_space<vmem>>, vector<4x256xf32>,
    %c16 = arith.constant 16 : index
    %c0_22 = arith.constant 0 : index
    %30 = vector.load %arg7[%c16, %c0_22] : memref<36x256xf32, #tpu.memory_space<vmem>>, vector<4x256xf32>
    tpu.vector_store %arg7[%c16, %c0_22], %9 {strides = array<i32>} : memref<36x256xf32, #tpu.memory_space<vmem>>, vector<4x256xf32>,
    %c255_i32 = arith.constant 255 : i32
    %31 = tpu.dynamic_rotate %9 by %c255_i32 dim 1 : vector<4x256xf32>, i32 -> vector<4x256xf32>
    %c5 = arith.constant 5 : index
    %c0_23 = arith.constant 0 : index
    %32 = vector.load %arg4[%c5, %c0_23] : memref<9x256xf32, #tpu.memory_space<vmem>>, vector<1x256xf32>
    %33 = vector.broadcast %32 : vector<1x256xf32> to vector<4x256xf32>
    %34 = arith.mulf %31, %33 : vector<4x256xf32>
    %c20 = arith.constant 20 : index
    %c0_24 = arith.constant 0 : index
    %35 = vector.load %arg7[%c20, %c0_24] : memref<36x256xf32, #tpu.memory_space<vmem>>, vector<4x256xf32>
    tpu.vector_store %arg7[%c20, %c0_24], %34 {strides = array<i32>} : memref<36x256xf32, #tpu.memory_space<vmem>>, vector<4x256xf32>,
    %c241_i32 = arith.constant 241 : i32
    %36 = tpu.dynamic_rotate %9 by %c241_i32 dim 1 : vector<4x256xf32>, i32 -> vector<4x256xf32>
    %c6 = arith.constant 6 : index
    %c0_25 = arith.constant 0 : index
    %37 = vector.load %arg4[%c6, %c0_25] : memref<9x256xf32, #tpu.memory_space<vmem>>, vector<1x256xf32>
    %38 = vector.broadcast %37 : vector<1x256xf32> to vector<4x256xf32>
    %39 = arith.mulf %36, %38 : vector<4x256xf32>
    %c24 = arith.constant 24 : index
    %c0_26 = arith.constant 0 : index
    %40 = vector.load %arg7[%c24, %c0_26] : memref<36x256xf32, #tpu.memory_space<vmem>>, vector<4x256xf32>
    tpu.vector_store %arg7[%c24, %c0_26], %39 {strides = array<i32>} : memref<36x256xf32, #tpu.memory_space<vmem>>, vector<4x256xf32>,
    %c240_i32 = arith.constant 240 : i32
    %41 = tpu.dynamic_rotate %9 by %c240_i32 dim 1 : vector<4x256xf32>, i32 -> vector<4x256xf32>
    %c7 = arith.constant 7 : index
    %c0_27 = arith.constant 0 : index
    %42 = vector.load %arg4[%c7, %c0_27] : memref<9x256xf32, #tpu.memory_space<vmem>>, vector<1x256xf32>
    %43 = vector.broadcast %42 : vector<1x256xf32> to vector<4x256xf32>
    %44 = arith.mulf %41, %43 : vector<4x256xf32>
    %c28 = arith.constant 28 : index
    %c0_28 = arith.constant 0 : index
    %45 = vector.load %arg7[%c28, %c0_28] : memref<36x256xf32, #tpu.memory_space<vmem>>, vector<4x256xf32>
    tpu.vector_store %arg7[%c28, %c0_28], %44 {strides = array<i32>} : memref<36x256xf32, #tpu.memory_space<vmem>>, vector<4x256xf32>,
    %c239_i32 = arith.constant 239 : i32
    %46 = tpu.dynamic_rotate %9 by %c239_i32 dim 1 : vector<4x256xf32>, i32 -> vector<4x256xf32>
    %c8_29 = arith.constant 8 : index
    %c0_30 = arith.constant 0 : index
    %47 = vector.load %arg4[%c8_29, %c0_30] : memref<9x256xf32, #tpu.memory_space<vmem>>, vector<1x256xf32>
    %48 = vector.broadcast %47 : vector<1x256xf32> to vector<4x256xf32>
    %49 = arith.mulf %46, %48 : vector<4x256xf32>
    %c32 = arith.constant 32 : index
    %c0_31 = arith.constant 0 : index
    %50 = vector.load %arg7[%c32, %c0_31] : memref<36x256xf32, #tpu.memory_space<vmem>>, vector<4x256xf32>
    tpu.vector_store %arg7[%c32, %c0_31], %49 {strides = array<i32>} : memref<36x256xf32, #tpu.memory_space<vmem>>, vector<4x256xf32>,
    %c0_32 = arith.constant 0 : index
    %c0_33 = arith.constant 0 : index
    %51 = vector.load %arg7[%c0_32, %c0_33] : memref<36x256xf32, #tpu.memory_space<vmem>>, vector<36x256xf32>
    %cst_34 = arith.constant dense<0.000000e+00> : vector<8x256xf32>
    %52 = tpu.matmul %3, %51, %cst_34 {dimension_numbers = #tpu.dot_dimension_numbers<[1], [0], [0], [1], [0, 0, 1, 1], [], []>} : vector<8x36xf32>, vector<36x256xf32>, vector<8x256xf32> -> vector<8x256xf32>
    %cst_35 = arith.constant 1.000000e-01 : f32
    %53 = vector.broadcast %cst_35 : f32 to vector<8x256xf32>
    %54 = arith.mulf %53, %52 : vector<8x256xf32>
    %55 = arith.maximumf %52, %54 : vector<8x256xf32>
    %cst_36 = arith.constant dense<0.000000e+00> : vector<4x256xf32>
    %56 = tpu.matmul %1, %55, %cst_36 {dimension_numbers = #tpu.dot_dimension_numbers<[1], [0], [0], [1], [0, 0, 1, 1], [], []>} : vector<4x8xf32>, vector<8x256xf32>, vector<4x256xf32> -> vector<4x256xf32>
    %cst_37 = arith.constant 1.000000e-01 : f32
    %57 = vector.broadcast %cst_37 : f32 to vector<4x256xf32>
    %58 = arith.mulf %57, %56 : vector<4x256xf32>
    %59 = arith.maximumf %56, %58 : vector<4x256xf32>
    %c17_i32_38 = arith.constant 17 : i32
    %60 = tpu.dynamic_rotate %59 by %c17_i32_38 dim 1 : vector<4x256xf32>, i32 -> vector<4x256xf32>
    %c0_39 = arith.constant 0 : index
    %c0_40 = arith.constant 0 : index
    %61 = vector.load %arg4[%c0_39, %c0_40] : memref<9x256xf32, #tpu.memory_space<vmem>>, vector<1x256xf32>
    %62 = vector.broadcast %61 : vector<1x256xf32> to vector<4x256xf32>
    %63 = arith.mulf %60, %62 : vector<4x256xf32>
    %c0_41 = arith.constant 0 : index
    %c0_42 = arith.constant 0 : index
    %64 = vector.load %arg7[%c0_41, %c0_42] : memref<36x256xf32, #tpu.memory_space<vmem>>, vector<4x256xf32>
    tpu.vector_store %arg7[%c0_41, %c0_42], %63 {strides = array<i32>} : memref<36x256xf32, #tpu.memory_space<vmem>>, vector<4x256xf32>,
    %c16_i32_43 = arith.constant 16 : i32
    %65 = tpu.dynamic_rotate %59 by %c16_i32_43 dim 1 : vector<4x256xf32>, i32 -> vector<4x256xf32>
    %c1_44 = arith.constant 1 : index
    %c0_45 = arith.constant 0 : index
    %66 = vector.load %arg4[%c1_44, %c0_45] : memref<9x256xf32, #tpu.memory_space<vmem>>, vector<1x256xf32>
    %67 = vector.broadcast %66 : vector<1x256xf32> to vector<4x256xf32>
    %68 = arith.mulf %65, %67 : vector<4x256xf32>
    %c4_46 = arith.constant 4 : index
    %c0_47 = arith.constant 0 : index
    %69 = vector.load %arg7[%c4_46, %c0_47] : memref<36x256xf32, #tpu.memory_space<vmem>>, vector<4x256xf32>
    tpu.vector_store %arg7[%c4_46, %c0_47], %68 {strides = array<i32>} : memref<36x256xf32, #tpu.memory_space<vmem>>, vector<4x256xf32>,
    %c15_i32_48 = arith.constant 15 : i32
    %70 = tpu.dynamic_rotate %59 by %c15_i32_48 dim 1 : vector<4x256xf32>, i32 -> vector<4x256xf32>
    %c2_49 = arith.constant 2 : index
    %c0_50 = arith.constant 0 : index
    %71 = vector.load %arg4[%c2_49, %c0_50] : memref<9x256xf32, #tpu.memory_space<vmem>>, vector<1x256xf32>
    %72 = vector.broadcast %71 : vector<1x256xf32> to vector<4x256xf32>
    %73 = arith.mulf %70, %72 : vector<4x256xf32>
    %c8_51 = arith.constant 8 : index
    %c0_52 = arith.constant 0 : index
    %74 = vector.load %arg7[%c8_51, %c0_52] : memref<36x256xf32, #tpu.memory_space<vmem>>, vector<4x256xf32>
    tpu.vector_store %arg7[%c8_51, %c0_52], %73 {strides = array<i32>} : memref<36x256xf32, #tpu.memory_space<vmem>>, vector<4x256xf32>,
    %c1_i32_53 = arith.constant 1 : i32
    %75 = tpu.dynamic_rotate %59 by %c1_i32_53 dim 1 : vector<4x256xf32>, i32 -> vector<4x256xf32>
    %c3_54 = arith.constant 3 : index
    %c0_55 = arith.constant 0 : index
    %76 = vector.load %arg4[%c3_54, %c0_55] : memref<9x256xf32, #tpu.memory_space<vmem>>, vector<1x256xf32>
    %77 = vector.broadcast %76 : vector<1x256xf32> to vector<4x256xf32>
    %78 = arith.mulf %75, %77 : vector<4x256xf32>
    %c12_56 = arith.constant 12 : index
    %c0_57 = arith.constant 0 : index
    %79 = vector.load %arg7[%c12_56, %c0_57] : memref<36x256xf32, #tpu.memory_space<vmem>>, vector<4x256xf32>
    tpu.vector_store %arg7[%c12_56, %c0_57], %78 {strides = array<i32>} : memref<36x256xf32, #tpu.memory_space<vmem>>, vector<4x256xf32>,
    %c16_58 = arith.constant 16 : index
    %c0_59 = arith.constant 0 : index
    %80 = vector.load %arg7[%c16_58, %c0_59] : memref<36x256xf32, #tpu.memory_space<vmem>>, vector<4x256xf32>
    tpu.vector_store %arg7[%c16_58, %c0_59], %59 {strides = array<i32>} : memref<36x256xf32, #tpu.memory_space<vmem>>, vector<4x256xf32>,
    %c255_i32_60 = arith.constant 255 : i32
    %81 = tpu.dynamic_rotate %59 by %c255_i32_60 dim 1 : vector<4x256xf32>, i32 -> vector<4x256xf32>
    %c5_61 = arith.constant 5 : index
    %c0_62 = arith.constant 0 : index
    %82 = vector.load %arg4[%c5_61, %c0_62] : memref<9x256xf32, #tpu.memory_space<vmem>>, vector<1x256xf32>
    %83 = vector.broadcast %82 : vector<1x256xf32> to vector<4x256xf32>
    %84 = arith.mulf %81, %83 : vector<4x256xf32>
    %c20_63 = arith.constant 20 : index
    %c0_64 = arith.constant 0 : index
    %85 = vector.load %arg7[%c20_63, %c0_64] : memref<36x256xf32, #tpu.memory_space<vmem>>, vector<4x256xf32>
    tpu.vector_store %arg7[%c20_63, %c0_64], %84 {strides = array<i32>} : memref<36x256xf32, #tpu.memory_space<vmem>>, vector<4x256xf32>,
    %c241_i32_65 = arith.constant 241 : i32
    %86 = tpu.dynamic_rotate %59 by %c241_i32_65 dim 1 : vector<4x256xf32>, i32 -> vector<4x256xf32>
    %c6_66 = arith.constant 6 : index
    %c0_67 = arith.constant 0 : index
    %87 = vector.load %arg4[%c6_66, %c0_67] : memref<9x256xf32, #tpu.memory_space<vmem>>, vector<1x256xf32>
    %88 = vector.broadcast %87 : vector<1x256xf32> to vector<4x256xf32>
    %89 = arith.mulf %86, %88 : vector<4x256xf32>
    %c24_68 = arith.constant 24 : index
    %c0_69 = arith.constant 0 : index
    %90 = vector.load %arg7[%c24_68, %c0_69] : memref<36x256xf32, #tpu.memory_space<vmem>>, vector<4x256xf32>
    tpu.vector_store %arg7[%c24_68, %c0_69], %89 {strides = array<i32>} : memref<36x256xf32, #tpu.memory_space<vmem>>, vector<4x256xf32>,
    %c240_i32_70 = arith.constant 240 : i32
    %91 = tpu.dynamic_rotate %59 by %c240_i32_70 dim 1 : vector<4x256xf32>, i32 -> vector<4x256xf32>
    %c7_71 = arith.constant 7 : index
    %c0_72 = arith.constant 0 : index
    %92 = vector.load %arg4[%c7_71, %c0_72] : memref<9x256xf32, #tpu.memory_space<vmem>>, vector<1x256xf32>
    %93 = vector.broadcast %92 : vector<1x256xf32> to vector<4x256xf32>
    %94 = arith.mulf %91, %93 : vector<4x256xf32>
    %c28_73 = arith.constant 28 : index
    %c0_74 = arith.constant 0 : index
    %95 = vector.load %arg7[%c28_73, %c0_74] : memref<36x256xf32, #tpu.memory_space<vmem>>, vector<4x256xf32>
    tpu.vector_store %arg7[%c28_73, %c0_74], %94 {strides = array<i32>} : memref<36x256xf32, #tpu.memory_space<vmem>>, vector<4x256xf32>,
    %c239_i32_75 = arith.constant 239 : i32
    %96 = tpu.dynamic_rotate %59 by %c239_i32_75 dim 1 : vector<4x256xf32>, i32 -> vector<4x256xf32>
    %c8_76 = arith.constant 8 : index
    %c0_77 = arith.constant 0 : index
    %97 = vector.load %arg4[%c8_76, %c0_77] : memref<9x256xf32, #tpu.memory_space<vmem>>, vector<1x256xf32>
    %98 = vector.broadcast %97 : vector<1x256xf32> to vector<4x256xf32>
    %99 = arith.mulf %96, %98 : vector<4x256xf32>
    %c32_78 = arith.constant 32 : index
    %c0_79 = arith.constant 0 : index
    %100 = vector.load %arg7[%c32_78, %c0_79] : memref<36x256xf32, #tpu.memory_space<vmem>>, vector<4x256xf32>
    tpu.vector_store %arg7[%c32_78, %c0_79], %99 {strides = array<i32>} : memref<36x256xf32, #tpu.memory_space<vmem>>, vector<4x256xf32>,
    %c0_80 = arith.constant 0 : index
    %c0_81 = arith.constant 0 : index
    %101 = vector.load %arg7[%c0_80, %c0_81] : memref<36x256xf32, #tpu.memory_space<vmem>>, vector<36x256xf32>
    %cst_82 = arith.constant dense<0.000000e+00> : vector<8x256xf32>
    %102 = tpu.matmul %4, %101, %cst_82 {dimension_numbers = #tpu.dot_dimension_numbers<[1], [0], [0], [1], [0, 0, 1, 1], [], []>} : vector<8x36xf32>, vector<36x256xf32>, vector<8x256xf32> -> vector<8x256xf32>
    %cst_83 = arith.constant 1.000000e-01 : f32
    %103 = vector.broadcast %cst_83 : f32 to vector<8x256xf32>
    %104 = arith.mulf %103, %102 : vector<8x256xf32>
    %105 = arith.maximumf %102, %104 : vector<8x256xf32>
    %c0_84 = arith.constant 0 : index
    %c0_85 = arith.constant 0 : index
    %106 = vector.load %arg5[%c0_84, %c0_85] : memref<8x256xf32, #tpu.memory_space<vmem>>, vector<8x256xf32>
    tpu.vector_store %arg5[%c0_84, %c0_85], %105 {strides = array<i32>} : memref<8x256xf32, #tpu.memory_space<vmem>>, vector<8x256xf32>,
    %cst_86 = arith.constant dense<0.000000e+00> : vector<1x256xf32>
    %107 = tpu.matmul %2, %105, %cst_86 {dimension_numbers = #tpu.dot_dimension_numbers<[1], [0], [0], [1], [0, 0, 1, 1], [], []>} : vector<1x8xf32>, vector<8x256xf32>, vector<1x256xf32> -> vector<1x256xf32>
    %cst_87 = arith.constant 1.000000e-01 : f32
    %108 = vector.broadcast %cst_87 : f32 to vector<1x256xf32>
    %109 = arith.mulf %108, %107 : vector<1x256xf32>
    %110 = arith.maximumf %107, %109 : vector<1x256xf32>
    %c0_88 = arith.constant 0 : index
    %c0_89 = arith.constant 0 : index
    %111 = vector.load %arg6[%c0_88, %c0_89] : memref<1x256xf32, #tpu.memory_space<vmem>>, vector<1x256xf32>
    tpu.vector_store %arg6[%c0_88, %c0_89], %110 {strides = array<i32>} : memref<1x256xf32, #tpu.memory_space<vmem>>, vector<1x256xf32>,
    return
  }
  func.func @transform_0(%arg0: i32) -> (i32, i32) {
    %c0_i32 = arith.constant 0 : i32
    %c0_i32_0 = arith.constant 0 : i32
    return %c0_i32, %arg0 : i32, i32
  }
  func.func @transform_1(%arg0: i32) -> (i32, i32) {
    %c0_i32 = arith.constant 0 : i32
    %c0_i32_0 = arith.constant 0 : i32
    %c0_i32_1 = arith.constant 0 : i32
    return %c0_i32, %c0_i32_0 : i32, i32
  }
  func.func @transform_2(%arg0: i32) -> (i32, i32) {
    %c0_i32 = arith.constant 0 : i32
    %c0_i32_0 = arith.constant 0 : i32
    %c0_i32_1 = arith.constant 0 : i32
    return %c0_i32, %c0_i32_0 : i32, i32
  }
  func.func @transform_3(%arg0: i32) -> (i32, i32) {
    %c0_i32 = arith.constant 0 : i32
    %c0_i32_0 = arith.constant 0 : i32
    %c0_i32_1 = arith.constant 0 : i32
    return %c0_i32, %c0_i32_0 : i32, i32
  }
  func.func @transform_4(%arg0: i32) -> (i32, i32) {
    %c0_i32 = arith.constant 0 : i32
    %c0_i32_0 = arith.constant 0 : i32
    return %c0_i32, %arg0 : i32, i32
  }
  func.func @transform_5(%arg0: i32) -> (i32, i32) {
    %c0_i32 = arith.constant 0 : i32
    %c0_i32_0 = arith.constant 0 : i32
    return %c0_i32, %arg0 : i32, i32
  }
}

</mosaic_0001>

<bundles_post_ra>
// kernel: lpr_detection_forward.1
= control target key start
LH: loop header
LB: loop body
LE: loop exit
PB: predicated region body
PF: predicated region fallthrough
CT: control target
= control target key end

     0   :  { %s1319_s18 = smov 0   ;;  %s1574_s0 = inlined_call_operand.vmem [shape: f32[8,512], index: 0, kind: input, shape index: {}]   ;;  %s1575_s1 = inlined_call_operand.vmem [shape: f32[9,8], index: 1, kind: input, shape index: {}]   ;;  %s1576_s2 = inlined_call_operand.vmem [shape: f32[16,36], index: 2, kind: input, shape index: {}]   ;;  %s1577_s3 = inlined_call_operand.vmem [shape: f32[9,256], index: 3, kind: input, shape index: {}]   ;;  %s1578_s4 = inlined_call_operand.vmem [shape: f32[8,512], index: 4, kind: output, shape index: {0}]   ;;  %s1579_s5 = inlined_call_operand.vmem [shape: f32[1,512], index: 5, kind: output, shape index: {1}]  }
   0x1 LB: > { %s1202_s19 = sadd.s32 4294967295, %s1277_s18   ;;  %p1206_p0 = scmp.ge.s32.totalorder %s1277_s18, 1  ;;  %s1277_s18 = sphi %s1319_s18, %s16_s18  }
   0x2   : > { %p191_p1 = scmp.lt.s32.totalorder %s1277_s18, 3 }
   0x4   : > { %p192_p2 = pnand %p1206_p0, %p191_p1 }
   0x5   : > { %s1207_s20 = sshll.u32 (!%p192_p2), %s1202_s19, 1  ;;  %v1279_v0 = vmov (!%p192_p2), 0.0   ;;  %v240_v3 = vld [vmem:[%s1575_s1] sm:$0xf] (!%p192_p2)  ;;  %vm247_vm0 = vcmask (!%p192_p2), 64512   ;;  %s1280_s27 = smov (!%p192_p2), 1   ;;  %v330_v10 = vlaneseq (!%p192_p2) }
   0x6   : > { %195 = sbr.rel (%p192_p2) target bundleno = 1430 (0x596), region = 36  ;;  %p224_p3 = scmp.lt.s32.totalorder (!%p192_p2), %s1207_s20, 3  ;;  %315 = vmatprep.mubr.f32.mxu0 (!%p192_p2), %v1279_v0  ;;  %630 = vmatprep.mubr.f32.mxu1 (!%p192_p2), %v1279_v0  ;;  %v1215_v15 = vld [vmem:[%s1577_s3 + $0x3] ss:$8 sm:$0x3] (!%p192_p2)  ;;  %vm559_vm9 = vcmask (!%p192_p2), 1043456  }
   0x7   : > { %s1281_s28 = smov (!%p192_p2), 16   ;;  %s1282_s29 = smov (!%p192_p2), 17   ;;  %v1359_v11 = vshrl.u32 (!%p192_p2), %v330_v10, 7  ;;  %v1362_v12 = vand.u32 (!%p192_p2), 127, %v330_v10  ;;  %vm555_vm10 = vcmask (!%p192_p2), 293888   ;;  %vm1115_vm11 = vcmp.lt.s32.totalorder (!%p192_p2), %v330_v10, 256 }
   0x8   : > { %s1283_s30 = smov (!%p192_p2), 15   ;;  %s1284_s6 = smov (!%p192_p2), 127   ;;  %v335_v20 = vld [vmem:[%s1577_s3] ss:$8 sm:$0x3] (!%p192_p2) }
   0x9   : > { %s1285_s7 = smov (!%p192_p2), 112   ;;  %s1286_s8 = smov (!%p192_p2), 113   ;;  %v1365_v13 = vsub.s32 (!%p192_p2), 0, %v1359_v11  ;;  %v1368_v14 = vsub.s32 (!%p192_p2), 1, %v1359_v11  ;;  %vm409_vm1 = vcmp.lt.s32.totalorder (!%p192_p2), %v1362_v12, 1  ;;  %vm332_vm2 = vcmp.lt.s32.totalorder (!%p192_p2), %v1362_v12, 17 }
   0xa   : > { %s1287_s9 = smov (!%p192_p2), 111   ;;  %v1214_v29 = vld [vmem:[%s1577_s3 + $0x2] ss:$8 sm:$0x3] (!%p192_p2)  ;;  %vm385_vm3 = vcmp.lt.s32.totalorder (!%p192_p2), %v1362_v12, 15  ;;  %vm441_vm4 = vcmp.lt.s32.totalorder (!%p192_p2), %v1362_v12, 127 }
   0xb   : > { %v418_v18 = vrot.slane (!%p192_p2), %v1215_v15, %v1365_v13  ;;  %v422_v19 = vrot.slane (!%p192_p2), %v1215_v15, %v1368_v14  ;;  %v340_v27 = vrot.slane (!%p192_p2), %v335_v20, %v1365_v13  ;;  %v344_v28 = vrot.slane (!%p192_p2), %v335_v20, %v1368_v14  ;;  %v1216_v36 = vld [vmem:[%s1577_s3 + $0x5] ss:$8 sm:$0x3] (!%p192_p2)  ;;  %v1213_v41 = vld [vmem:[%s1577_s3 + $0x1] ss:$8 sm:$0x3] (!%p192_p2) }
   0xc   : > { %v394_v39 = vrot.slane (!%p192_p2), %v1214_v29, %v1365_v13  ;;  %v398_v40 = vrot.slane (!%p192_p2), %v1214_v29, %v1368_v14  ;;  %v450_v44 = vrot.slane (!%p192_p2), %v1216_v36, %v1365_v13  ;;  %v454_v47 = vrot.slane (!%p192_p2), %v1216_v36, %v1368_v14  ;;  %v1218_v48 = vld [vmem:[%s1577_s3 + $0x7] ss:$8 sm:$0x3] (!%p192_p2)  ;;  %v1219_v20 = vld [vmem:[%s1577_s3 + $0x10] ss:$8 sm:$0x3] (!%p192_p2) }
   0xd   : > { %s1581_s20 = smov (!%p224_p3, %s1207_s20), 3  ;;  %vm355_vm5 = vcmp.lt.s32.totalorder %v1362_v12, 16  ;;  %v364_v51 = vrot.slane %v1213_v41, %v1365_v13  ;;  %v368_v52 = vrot.slane %v1213_v41, %v1368_v14  ;;  %vm495_vm6 = vcmp.lt.s32.totalorder %v1362_v12, 112 }
   0xe   : > { %s1208_s21 = sshll.u32 %s1581_s20, 3  ;;  %v504_v55 = vrot.slane %v1218_v48, %v1365_v13  ;;  %v508_v56 = vrot.slane %v1218_v48, %v1368_v14  ;;  %vm471_vm7 = vcmp.lt.s32.totalorder %v1362_v12, 113  ;;  %vm525_vm8 = vcmp.lt.s32.totalorder %v1362_v12, 111  ;;  %v244_v12 = vld [vmem:[%s1576_s2 + $0x8] sm:$0xff] }
   0xf   : > { %s227_s24 = scalar_lea.vmem %s1574_s0, %s1208_s21  ;;  %v534_v29 = vrot.slane %v1219_v20, %v1365_v13  ;;  %s233_s14 = scalar_lea.vmem %s1578_s4, %s1208_s21 }
  0x10   : > { %v246_v1 = vld [vmem:[%s227_s24 + $0x8] sm:$0xff]  ;;  %v245_v2 = vld [vmem:[%s227_s24] sm:$0xff] }
  0x11   : > { %251 = vmatprep.subr.mxu0 %v246_v1 }
  0x12   : > { %252 = vmatpush1.msra.mxu0 %v245_v2  ;;  %v1217_v2 = vld [vmem:[%s1577_s3 + $0x6] ss:$8 sm:$0x3] }
  0x13   : > { %1212 = vmatmul.mubr.msk.f32.vlgmr.msra.gmra.mrb[0].mxu0 %vm247_vm0, %v240_v3 }
  0x14   : > { %708 = vmatprep.mubr.f32.mxu0 %v1279_v0 }
  0xe6   : > { %v317_v4 = vpop.f32.mrb[0].mxu0 }
  0xe7   : > { %v322_v5 = vmul.f32 0.1, %v317_v4  ;;  %v319_v6 = vpop.f32.mrb[1].mxu0 }
  0xe8   : > { %v323_v7 = vmul.f32 0.1, %v319_v6 }
  0xe9   : > { %v324_v8 = vmax.f32 %v317_v4, %v322_v5 }
  0xea   : > { %v325_v9 = vmax.f32 %v319_v6, %v323_v7 }
  0xeb   : > { %435 = vst [vmem:[#allocation2 + $0x20] sm:$0xf] %v324_v8  ;;  %405 = vrot.lane.b32.xlu1 %v324_v8, %s1280_s27  ;;  %351 = vrot.lane.b32.xlu0 %v324_v8, %s1281_s28 }
  0xec   : > { %436 = vst [vmem:[#allocation2 + $0x28] sm:$0xf] %v325_v9 }
  0xef   : > { %326 = vrot.lane.b32.xlu0 %v324_v8, %s1282_s29  ;;  %407 = vrot.lane.b32.xlu1 %v325_v9, %s1280_s27 }
  0xf3   : > { %381 = vrot.lane.b32.xlu0 %v324_v8, %s1283_s30  ;;  %328 = vrot.lane.b32.xlu1 %v325_v9, %s1282_s29 }
  0xf7   : > { %437 = vrot.lane.b32.xlu0 %v324_v8, %s1284_s6  ;;  %383 = vrot.lane.b32.xlu1 %v325_v9, %s1283_s30 }
  0xfb   : > { %439 = vrot.lane.b32.xlu1 %v325_v9, %s1284_s6  ;;  %353 = vrot.lane.b32.xlu0 %v325_v9, %s1281_s28 }
  0xff   : > { %493 = vrot.lane.b32.xlu1 %v325_v9, %s1285_s7  ;;  %491 = vrot.lane.b32.xlu0 %v324_v8, %s1285_s7 }
 0x103   : > { %469 = vrot.lane.b32.xlu1 %v325_v9, %s1286_s8  ;;  %467 = vrot.lane.b32.xlu0 %v324_v8, %s1286_s8 }
 0x107   : > { %523 = vrot.lane.b32.xlu1 %v325_v9, %s1287_s9  ;;  %521 = vrot.lane.b32.xlu0 %v324_v8, %s1287_s9 }
 0x15d   : > { %v406_v16 = vpop.permute.xlu1 %405  ;;  %v352_v17 = vpop.permute.xlu0 %351 }
 0x161   : > { %v327_v21 = vpop.permute.xlu0 %326  ;;  %v408_v22 = vpop.permute.xlu1 %407 }
 0x162   : > { %v410_v23 = vsel %vm409_vm1, %v406_v16, %v408_v22  ;;  %v411_v24 = vsel %vm409_vm1, %v408_v22, %v406_v16 }
 0x163   : > { %v425_v25 = vmul.f32 %v418_v18, %v411_v24  ;;  %v426_v26 = vmul.f32 %v422_v19, %v410_v23  ;;  %v480_v18 = vrot.slane %v1217_v2, %v1365_v13  ;;  %v484_v19 = vrot.slane %v1217_v2, %v1368_v14 }
 0x165   : > { %v429_v30 = vrot.slane %v425_v25, 4  ;;  %v430_v31 = vrot.slane %v426_v26, 4  ;;  %v382_v32 = vpop.permute.xlu0 %381  ;;  %v329_v33 = vpop.permute.xlu1 %328 }
 0x166   : > { %v333_v34 = vsel %vm332_vm2, %v327_v21, %v329_v33  ;;  %v334_v35 = vsel %vm332_vm2, %v329_v33, %v327_v21 }
 0x167   : > { %433 = vst [vmem:[#allocation2 + $0x10] sm:$0xf0] %v429_v30  ;;  %434 = vst [vmem:[#allocation2 + $0x18] sm:$0xf0] %v430_v31  ;;  %v347_v37 = vmul.f32 %v340_v27, %v334_v35  ;;  %v348_v38 = vmul.f32 %v344_v28, %v333_v34  ;;  %v538_v30 = vrot.slane %v1219_v20, %v1368_v14 }
 0x169   : > { %349 = vst [vmem:[#allocation2] sm:$0xf] %v347_v37  ;;  %350 = vst [vmem:[#allocation2 + $0x8] sm:$0xf] %v348_v38  ;;  %v438_v42 = vpop.permute.xlu0 %437  ;;  %v384_v43 = vpop.permute.xlu1 %383 }
 0x16a   : > { %v386_v45 = vsel %vm385_vm3, %v382_v32, %v384_v43  ;;  %v387_v46 = vsel %vm385_vm3, %v384_v43, %v382_v32 }
 0x16b   : > { %v401_v49 = vmul.f32 %v394_v39, %v387_v46  ;;  %v402_v50 = vmul.f32 %v398_v40, %v386_v45 }
 0x16d   : > { %403 = vst [vmem:[#allocation2 + $0x10] sm:$0xf] %v401_v49  ;;  %404 = vst [vmem:[#allocation2 + $0x18] sm:$0xf] %v402_v50  ;;  %v440_v53 = vpop.permute.xlu1 %439  ;;  %v354_v54 = vpop.permute.xlu0 %353  ;;  %v243_v50 = vld [vmem:[%s1576_s2] sm:$0xff] }
 0x16e   : > { %v442_v57 = vsel %vm441_vm4, %v438_v42, %v440_v53  ;;  %v443_v58 = vsel %vm441_vm4, %v440_v53, %v438_v42  ;;  %v356_v59 = vsel %vm355_vm5, %v352_v17, %v354_v54  ;;  %v357_v60 = vsel %vm355_vm5, %v354_v54, %v352_v17 }
 0x16f   : > { %v457_v61 = vmul.f32 %v450_v44, %v442_v57  ;;  %v458_v62 = vmul.f32 %v454_v47, %v443_v58  ;;  %v371_v63 = vmul.f32 %v364_v51, %v357_v60  ;;  %v372_v1 = vmul.f32 %v368_v52, %v356_v59  ;;  %v241_v58 = vld [vmem:[%s1575_s1 + $0x4] sm:$0xf] }
 0x171   : > { %v461_v3 = vrot.slane %v457_v61, 4  ;;  %v462_v4 = vrot.slane %v458_v62, 4  ;;  %v375_v5 = vrot.slane %v371_v63, 4  ;;  %v376_v6 = vrot.slane %v372_v1, 4  ;;  %v494_v7 = vpop.permute.xlu1 %493  ;;  %v492_v8 = vpop.permute.xlu0 %491 }
 0x172   : > { %v496_v9 = vsel %vm495_vm6, %v492_v8, %v494_v7  ;;  %v497_v15 = vsel %vm495_vm6, %v494_v7, %v492_v8 }
 0x173   : > { %465 = vst [vmem:[#allocation2 + $0x20] sm:$0xf0] %v461_v3  ;;  %466 = vst [vmem:[#allocation2 + $0x28] sm:$0xf0] %v462_v4  ;;  %v511_v16 = vmul.f32 %v504_v55, %v496_v9  ;;  %v512_v17 = vmul.f32 %v508_v56, %v497_v15 }
 0x174   : > { %379 = vst [vmem:[#allocation2] sm:$0xf0] %v375_v5  ;;  %380 = vst [vmem:[#allocation2 + $0x8] sm:$0xf0] %v376_v6  ;;  %v548_v33 = vld [vmem:[#allocation2 + $0x18] sm:$0xff]  ;;  %v547_v38 = vld [vmem:[#allocation2 + $0x10] sm:$0xff] }
 0x175   : > { %v515_v21 = vrot.slane %v511_v16, 4  ;;  %v516_v22 = vrot.slane %v512_v17, 4  ;;  %v470_v23 = vpop.permute.xlu1 %469  ;;  %v468_v24 = vpop.permute.xlu0 %467  ;;  %v1226_v5 = vld [vmem:[%s1577_s3 + $0x3] ss:$8 sm:$0x3] }
 0x176   : > { %v472_v25 = vsel %vm471_vm7, %v468_v24, %v470_v23  ;;  %v473_v26 = vsel %vm471_vm7, %v470_v23, %v468_v24  ;;  %v802_v16 = vrot.slane %v1226_v5, %v1365_v13  ;;  %v806_v17 = vrot.slane %v1226_v5, %v1368_v14 }
 0x177   : > { %519 = vst [vmem:[#allocation2 + $0x30] sm:$0xf0] %v515_v21  ;;  %520 = vst [vmem:[#allocation2 + $0x38] sm:$0xf0] %v516_v22  ;;  %v487_v27 = vmul.f32 %v480_v18, %v472_v25  ;;  %v488_v28 = vmul.f32 %v484_v19, %v473_v26 }
 0x178   : > { %v725_v19 = vld [vmem:[%s1577_s3] ss:$8 sm:$0x3] }
 0x179   : > { %489 = vst [vmem:[#allocation2 + $0x30] sm:$0xf] %v487_v27  ;;  %490 = vst [vmem:[#allocation2 + $0x38] sm:$0xf] %v488_v28  ;;  %v524_v31 = vpop.permute.xlu1 %523  ;;  %v522_v32 = vpop.permute.xlu0 %521  ;;  %v730_v27 = vrot.slane %v725_v19, %v1365_v13  ;;  %v734_v28 = vrot.slane %v725_v19, %v1368_v14 }
 0x17a   : > { %v526_v34 = vsel %vm525_vm8, %v522_v32, %v524_v31  ;;  %v527_v35 = vsel %vm525_vm8, %v524_v31, %v522_v32  ;;  %v550_v43 = vld [vmem:[#allocation2 + $0x28] sm:$0xff]  ;;  %v549_v45 = vld [vmem:[#allocation2 + $0x20] sm:$0xff] }
 0x17b   : > { %v546_v36 = vld [vmem:[#allocation2 + $0x8] sm:$0xff]  ;;  %v545_v37 = vld [vmem:[#allocation2] sm:$0xff]  ;;  %v541_v39 = vmul.f32 %v534_v29, %v526_v34  ;;  %v542_v40 = vmul.f32 %v538_v30, %v527_v35 }
 0x17c   : > { %v1237_v41 = vpack.c.bf16 %v548_v33, %v546_v36  ;;  %v1239_v42 = vpack.c.bf16 %v547_v38, %v545_v37  ;;  %v1225_v30 = vld [vmem:[%s1577_s3 + $0x2] ss:$8 sm:$0x3] }
 0x17d   : > { %543 = vst [vmem:[#allocation2 + $0x40] sm:$0xf] %v541_v39  ;;  %544 = vst [vmem:[#allocation2 + $0x48] sm:$0xf] %v542_v40  ;;  %v780_v38 = vrot.slane %v1225_v30, %v1365_v13  ;;  %v784_v39 = vrot.slane %v1225_v30, %v1368_v14 }
 0x17e   : > { %1238 = vmatprep.subr.bf16.mxu1 %v1237_v41  ;;  %v1227_v41 = vld [vmem:[%s1577_s3 + $0x5] ss:$8 sm:$0x3] }
 0x17f   : > { %1240 = vmatpush1.bf16.msra.mxu1 %v1239_v42 }
 0x180   : > { %v552_v44 = vld [vmem:[#allocation2 + $0x38] sm:$0xff]  ;;  %v551_v46 = vld [vmem:[#allocation2 + $0x30] sm:$0xff] }
 0x181   : > { %v1241_v47 = vpack.c.bf16 %v552_v44, %v550_v43  ;;  %v1243_v48 = vpack.c.bf16 %v551_v46, %v549_v45 }
 0x183   : > { %1242 = vmatprep.subr.bf16.mxu1 %v1241_v47  ;;  %v832_v47 = vrot.slane %v1227_v41, %v1365_v13 }
 0x184   : > { %1244 = vmatpush1.bf16.msra.mxu1 %v1243_v48  ;;  %v554_v49 = vld [vmem:[#allocation2 + $0x48] sm:$0xf]  ;;  %v553_v51 = vld [vmem:[#allocation2 + $0x40] sm:$0xf]  ;;  %v836_v48 = vrot.slane %v1227_v41, %v1368_v14 }
 0x185   : > { %1220 = vmatprep.subr.msk.mxu1 %vm559_vm9, %v554_v49 }
 0x188   : > { %1221 = vmatpush1.msk.msra.mxu1 %vm559_vm9, %v553_v51 }
 0x189   : > { %1222 = vmatmul.mubr.msk.f32.vlgmr.msra.gmra.mrb[0].mxu1 %vm555_vm10, %v243_v50  ;;  %v1229_v50 = vld [vmem:[%s1577_s3 + $0x7] ss:$8 sm:$0x3] }
 0x18a   : > { %1084 = vmatprep.mubr.f32.mxu1 %v1279_v0 }
 0x25c   : > { %v632_v52 = vpop.f32.mrb[0].mxu1 }
 0x25d   : > { %v637_v53 = vmul.f32 0.1, %v632_v52  ;;  %v634_v54 = vpop.f32.mrb[1].mxu1 }
 0x25e   : > { %v638_v55 = vmul.f32 0.1, %v634_v54 }
 0x25f   : > { %v639_v57 = vmax.f32 %v632_v52, %v637_v53 }
 0x260   : > { %v640_v56 = vmax.f32 %v634_v54, %v638_v55 }
 0x262   : > { %644 = vmatprep.subr.mxu0 %v640_v56  ;;  %v882_v56 = vrot.slane %v1229_v50, %v1365_v13 }
 0x263   : > { %645 = vmatpush1.msra.mxu0 %v639_v57  ;;  %v886_v57 = vrot.slane %v1229_v50, %v1368_v14 }
 0x264   : > { %1223 = vmatmul.mubr.msk.f32.vlgmr.msra.gmra.mrb[2].mxu0 %vm247_vm0, %v241_v58 }
 0x265   : > { %1004 = vmatprep.mubr.f32.mxu0 %v1279_v0  ;;  %v1224_v0 = vld [vmem:[%s1577_s3 + $0x1] ss:$8 sm:$0x3] }
 0x266   : > { %v752_v2 = vrot.slane %v1224_v0, %v1365_v13  ;;  %v756_v3 = vrot.slane %v1224_v0, %v1368_v14 }
 0x337   : > { %v710_v59 = vpop.f32.mrb[2].mxu0 }
 0x338   : > { %v715_v60 = vmul.f32 0.1, %v710_v59  ;;  %v712_v61 = vpop.f32.mrb[3].mxu0 }
 0x339   : > { %v716_v62 = vmul.f32 0.1, %v712_v61 }
 0x33a   : > { %v717_v63 = vmax.f32 %v710_v59, %v715_v60  ;;  %v1228_v59 = vld [vmem:[%s1577_s3 + $0x6] ss:$8 sm:$0x3] }
 0x33b   : > { %v718_v1 = vmax.f32 %v712_v61, %v716_v62 }
 0x33c   : > { %819 = vst [vmem:[#allocation2 + $0x20] sm:$0xf] %v717_v63  ;;  %741 = vrot.lane.b32.xlu0 %v717_v63, %s1281_s28 }
 0x33d   : > { %820 = vst [vmem:[#allocation2 + $0x28] sm:$0xf] %v718_v1  ;;  %743 = vrot.lane.b32.xlu1 %v718_v1, %s1281_s28 }
 0x340   : > { %791 = vrot.lane.b32.xlu0 %v717_v63, %s1280_s27 }
 0x341   : > { %793 = vrot.lane.b32.xlu1 %v718_v1, %s1280_s27 }
 0x344   : > { %719 = vrot.lane.b32.xlu0 %v717_v63, %s1282_s29 }
 0x345   : > { %721 = vrot.lane.b32.xlu1 %v718_v1, %s1282_s29  ;;  %s238_s29 = scalar_lea.vmem %s1579_s5, %s1581_s20 }
 0x348   : > { %769 = vrot.lane.b32.xlu0 %v717_v63, %s1283_s30 }
 0x349   : > { %771 = vrot.lane.b32.xlu1 %v718_v1, %s1283_s30 }
 0x34c   : > { %821 = vrot.lane.b32.xlu0 %v717_v63, %s1284_s6 }
 0x34d   : > { %823 = vrot.lane.b32.xlu1 %v718_v1, %s1284_s6 }
 0x350   : > { %871 = vrot.lane.b32.xlu0 %v717_v63, %s1285_s7 }
 0x351   : > { %873 = vrot.lane.b32.xlu1 %v718_v1, %s1285_s7 }
 0x354   : > { %849 = vrot.lane.b32.xlu0 %v717_v63, %s1286_s8 }
 0x355   : > { %851 = vrot.lane.b32.xlu1 %v718_v1, %s1286_s8 }
 0x358   : > { %899 = vrot.lane.b32.xlu0 %v717_v63, %s1287_s9 }
 0x359   : > { %901 = vrot.lane.b32.xlu1 %v718_v1, %s1287_s9 }
 0x3ae   : > { %v742_v4 = vpop.permute.xlu0 %741 }
 0x3af   : > { %v744_v6 = vpop.permute.xlu1 %743 }
 0x3b0   : > { %v745_v7 = vsel %vm355_vm5, %v742_v4, %v744_v6  ;;  %v746_v8 = vsel %vm355_vm5, %v744_v6, %v742_v4  ;;  %v864_v4 = vrot.slane %v1228_v59, %v1368_v14  ;;  %v1230_v6 = vld [vmem:[%s1577_s3 + $0x10] ss:$8 sm:$0x3] }
 0x3b1   : > { %v759_v9 = vmul.f32 %v752_v2, %v746_v8  ;;  %v760_v15 = vmul.f32 %v756_v3, %v745_v7  ;;  %v860_v3 = vrot.slane %v1228_v59, %v1365_v13 }
 0x3b2   : > { %v792_v18 = vpop.permute.xlu0 %791 }
 0x3b3   : > { %v763_v20 = vrot.slane %v759_v9, 4  ;;  %v764_v21 = vrot.slane %v760_v15, 4  ;;  %v794_v22 = vpop.permute.xlu1 %793 }
 0x3b4   : > { %v795_v23 = vsel %vm409_vm1, %v792_v18, %v794_v22  ;;  %v796_v24 = vsel %vm409_vm1, %v794_v22, %v792_v18 }
 0x3b5   : > { %767 = vst [vmem:[#allocation2] sm:$0xf0] %v763_v20  ;;  %768 = vst [vmem:[#allocation2 + $0x8] sm:$0xf0] %v764_v21  ;;  %v809_v25 = vmul.f32 %v802_v16, %v796_v24  ;;  %v810_v26 = vmul.f32 %v806_v17, %v795_v23 }
 0x3b6   : > { %v720_v29 = vpop.permute.xlu0 %719 }
 0x3b7   : > { %v813_v31 = vrot.slane %v809_v25, 4  ;;  %v814_v32 = vrot.slane %v810_v26, 4  ;;  %v722_v33 = vpop.permute.xlu1 %721  ;;  %v910_v25 = vrot.slane %v1230_v6, %v1365_v13  ;;  %v914_v26 = vrot.slane %v1230_v6, %v1368_v14 }
 0x3b8   : > { %v723_v34 = vsel %vm332_vm2, %v720_v29, %v722_v33  ;;  %v724_v35 = vsel %vm332_vm2, %v722_v33, %v720_v29 }
 0x3b9   : > { %817 = vst [vmem:[#allocation2 + $0x10] sm:$0xf0] %v813_v31  ;;  %818 = vst [vmem:[#allocation2 + $0x18] sm:$0xf0] %v814_v32  ;;  %v737_v36 = vmul.f32 %v730_v27, %v724_v35  ;;  %v738_v37 = vmul.f32 %v734_v28, %v723_v34 }
 0x3ba   : > { %v770_v40 = vpop.permute.xlu0 %769 }
 0x3bb   : > { %739 = vst [vmem:[#allocation2] sm:$0xf] %v737_v36  ;;  %740 = vst [vmem:[#allocation2 + $0x8] sm:$0xf] %v738_v37  ;;  %v772_v42 = vpop.permute.xlu1 %771 }
 0x3bc   : > { %v773_v43 = vsel %vm385_vm3, %v770_v40, %v772_v42  ;;  %v774_v44 = vsel %vm385_vm3, %v772_v42, %v770_v40 }
 0x3bd   : > { %v787_v45 = vmul.f32 %v780_v38, %v774_v44  ;;  %v788_v46 = vmul.f32 %v784_v39, %v773_v43 }
 0x3be   : > { %v822_v49 = vpop.permute.xlu0 %821 }
 0x3bf   : > { %789 = vst [vmem:[#allocation2 + $0x10] sm:$0xf] %v787_v45  ;;  %790 = vst [vmem:[#allocation2 + $0x18] sm:$0xf] %v788_v46  ;;  %v824_v51 = vpop.permute.xlu1 %823  ;;  %v242_v45 = vld [vmem:[%s1575_s1 + $0x8] sm:$0x1] }
 0x3c0   : > { %v825_v52 = vsel %vm441_vm4, %v822_v49, %v824_v51  ;;  %v826_v53 = vsel %vm441_vm4, %v824_v51, %v822_v49  ;;  %v1288_v46 = vmov 1966171168  }
 0x3c1   : > { %v839_v54 = vmul.f32 %v832_v47, %v825_v52  ;;  %v840_v55 = vmul.f32 %v836_v48, %v826_v53  ;;  %v1099_v47 = vunpack.c.l.s4 %v1288_v46 }
 0x3c2   : > { %v872_v58 = vpop.permute.xlu0 %871  ;;  %v922_v5 = vld [vmem:[#allocation2 + $0x8] sm:$0xff]  ;;  %v921_v9 = vld [vmem:[#allocation2] sm:$0xff] }
 0x3c3   : > { %v843_v60 = vrot.slane %v839_v54, 4  ;;  %v844_v61 = vrot.slane %v840_v55, 4  ;;  %v874_v62 = vpop.permute.xlu1 %873  ;;  %v1100_v49 = vunpack.c.0.s8 %v1099_v47 }
 0x3c4   : > { %v875_v63 = vsel %vm495_vm6, %v872_v58, %v874_v62  ;;  %v876_v1 = vsel %vm495_vm6, %v874_v62, %v872_v58 }
 0x3c5   : > { %847 = vst [vmem:[#allocation2 + $0x20] sm:$0xf0] %v843_v60  ;;  %848 = vst [vmem:[#allocation2 + $0x28] sm:$0xf0] %v844_v61  ;;  %v889_v0 = vmul.f32 %v882_v56, %v875_v63  ;;  %v890_v2 = vmul.f32 %v886_v57, %v876_v1  ;;  %v1103_v55 = vsub.s32 %v1100_v49, %v1359_v11 }
 0x3c6   : > { %v850_v7 = vpop.permute.xlu0 %849  ;;  %v924_v8 = vld [vmem:[#allocation2 + $0x18] sm:$0xff]  ;;  %v923_v15 = vld [vmem:[#allocation2 + $0x10] sm:$0xff] }
 0x3c7   : > { %v893_v16 = vrot.slane %v889_v0, 4  ;;  %v894_v17 = vrot.slane %v890_v2, 4  ;;  %v852_v18 = vpop.permute.xlu1 %851  ;;  %v1245_v19 = vpack.c.bf16 %v924_v8, %v922_v5  ;;  %v1247_v20 = vpack.c.bf16 %v923_v15, %v921_v9 }
 0x3c8   : > { %v853_v21 = vsel %vm471_vm7, %v850_v7, %v852_v18  ;;  %v854_v22 = vsel %vm471_vm7, %v852_v18, %v850_v7 }
 0x3c9   : > { %897 = vst [vmem:[#allocation2 + $0x30] sm:$0xf0] %v893_v16  ;;  %898 = vst [vmem:[#allocation2 + $0x38] sm:$0xf0] %v894_v17  ;;  %v867_v23 = vmul.f32 %v860_v3, %v853_v21  ;;  %v868_v24 = vmul.f32 %v864_v4, %v854_v22  ;;  %1246 = vmatprep.subr.bf16.mxu0 %v1245_v19 }
 0x3ca   : > { %v900_v27 = vpop.permute.xlu0 %899  ;;  %1248 = vmatpush1.bf16.msra.mxu0 %v1247_v20 }
 0x3cb   : > { %869 = vst [vmem:[#allocation2 + $0x30] sm:$0xf] %v867_v23  ;;  %870 = vst [vmem:[#allocation2 + $0x38] sm:$0xf] %v868_v24  ;;  %v902_v28 = vpop.permute.xlu1 %901 }
 0x3cc   : > { %v903_v29 = vsel %vm525_vm8, %v900_v27, %v902_v28  ;;  %v904_v30 = vsel %vm525_vm8, %v902_v28, %v900_v27  ;;  %v926_v33 = vld [vmem:[#allocation2 + $0x28] sm:$0xff]  ;;  %v925_v13 = vld [vmem:[#allocation2 + $0x20] sm:$0xff] }
 0x3cd   : > { %v917_v31 = vmul.f32 %v910_v25, %v903_v29  ;;  %v918_v32 = vmul.f32 %v914_v26, %v904_v30 }
 0x3cf   : > { %919 = vst [vmem:[#allocation2 + $0x40] sm:$0xf] %v917_v31  ;;  %920 = vst [vmem:[#allocation2 + $0x48] sm:$0xf] %v918_v32 }
 0x3d2   : > { %v928_v34 = vld [vmem:[#allocation2 + $0x38] sm:$0xff]  ;;  %v927_v14 = vld [vmem:[#allocation2 + $0x30] sm:$0xff] }
 0x3d3   : > { %v1249_v35 = vpack.c.bf16 %v928_v34, %v926_v33  ;;  %v1251_v36 = vpack.c.bf16 %v927_v14, %v925_v13 }
 0x3d5   : > { %1250 = vmatprep.subr.bf16.mxu0 %v1249_v35 }
 0x3d6   : > { %1252 = vmatpush1.bf16.msra.mxu0 %v1251_v36  ;;  %v930_v37 = vld [vmem:[#allocation2 + $0x48] sm:$0xf]  ;;  %v929_v38 = vld [vmem:[#allocation2 + $0x40] sm:$0xf] }
 0x3d7   : > { %1231 = vmatprep.subr.msk.mxu0 %vm559_vm9, %v930_v37 }
 0x3da   : > { %1232 = vmatpush1.msk.msra.mxu0 %vm559_vm9, %v929_v38 }
 0x3db   : > { %1233 = vmatmul.mubr.msk.f32.vlgmr.msra.gmra.mrb[4].mxu0 %vm555_vm10, %v244_v12 }
 0x4ae   : > { %v1006_v39 = vpop.f32.mrb[4].mxu0 }
 0x4af   : > { %v1011_v40 = vmul.f32 0.1, %v1006_v39  ;;  %v1008_v41 = vpop.f32.mrb[5].mxu0 }
 0x4b0   : > { %v1012_v42 = vmul.f32 0.1, %v1008_v41 }
 0x4b1   : > { %v1013_v43 = vmax.f32 %v1006_v39, %v1011_v40 }
 0x4b2   : > { %v1014_v44 = vmax.f32 %v1008_v41, %v1012_v42 }
 0x4b3   : > { %1015 = vst [vmem:[%s233_s14] sm:$0xff] %v1013_v43 }
 0x4b4   : > { %1016 = vst [vmem:[%s233_s14 + $0x8] sm:$0xff] %v1014_v44  ;;  %1020 = vmatprep.subr.mxu1 %v1014_v44 }
 0x4b5   : > { %1021 = vmatpush1.msra.mxu1 %v1013_v43 }
 0x4b6   : > { %1234 = vmatmul.mubr.msk.f32.vlgmr.msra.gmra.mrb[2].mxu1 %vm247_vm0, %v242_v45 }
 0x589   : > { %v1086_v48 = vpop.f32.mrb[2].mxu1 }
 0x58a   : > { %v1091_v50 = vmul.f32 0.1, %v1086_v48  ;;  %v1088_v51 = vpop.f32.mrb[3].mxu1 }
 0x58b   : > { %v1092_v52 = vmul.f32 0.1, %v1088_v51 }
 0x58c   : > { %v1093_v53 = vmax.f32 %v1086_v48, %v1091_v50 }
 0x58d   : > { %v1094_v54 = vmax.f32 %v1088_v51, %v1092_v52 }
 0x58f   : > { %v1097_v56 = vcombine.low %v1093_v53, %v1094_v54 }
 0x591   : > { %v1104_v57 = vrot.slane %v1097_v56, %v1103_v55 }
 0x593   : > { %v1111_v58 = vrot.slane %v1104_v57, %v1103_v55 }
 0x595   : > { %1117 = vst.msk [vmem:[%s238_s29] sm:$0x3] %vm1115_vm11, %v1111_v58 }
 0x596 PF: > { %s16_s18 = sadd.s32 1, %s1277_s18  }
 0x597   : > { %p13_p4 = scmp.ge.s32.totalorder %s16_s18, 4  }
 0x599   :  { %15 = sbr.rel (!%p13_p4) target bundleno = 1 (0x1), region = 85 }

</bundles_post_ra>
